<compile_context>
chip_gen: v7x
topology: tpu7x:2x2x1
jax: 0.10.0
libtpu: 0.0.40
codegen_flags: <defaults>
</compile_context>

<pallas_src>
import functools

import jax
import jax.numpy as jnp
from jax.experimental import pallas as pl
from jax.experimental.pallas import tpu as pltpu


INPUT_SIZE = 28
NUM_CLASSES = 9
BN_EPS = 1e-5

# 2048 lanes/tile: small enough that two grid steps appear at batch>=4096
# (lights up both v7x TensorCores), comfortably inside even the v5e scoped-VMEM
# default (feature-major buffers are lane-dense, so no 128-lane padding waste),
# big enough to amortize the ~0.35 us per-grid-step overhead.
DEFAULT_TILE_B = 2048


# ----------------------------- kernel ----------------------------------------

def pose_classifier_kernel(x_ref,
                           w1_ref, c1_ref, w2_ref, c2_ref,
                           w3_ref, c3_ref, p3_ref, w4_ref, c4_ref,
                           o_ref, *, cb, n_chunks):
    f32 = jnp.float32

    def mm(w_ref, act):
        # bf16 MXU operands, f32 accumulation (native rate on v6e/v7x).
        return jnp.dot(w_ref[...], act.astype(w_ref.dtype),
                       preferred_element_type=f32)

    # Per-feature constants broadcast to chunk width ONCE (hoisted out of the
    # chunk loop: JAX does not CSE broadcast_in_dim).
    c1 = jnp.broadcast_to(c1_ref[...], (c1_ref.shape[0], cb))
    c2 = jnp.broadcast_to(c2_ref[...], (c2_ref.shape[0], cb))
    c3 = jnp.broadcast_to(c3_ref[...], (c3_ref.shape[0], cb))
    p3 = jnp.broadcast_to(p3_ref[...], (p3_ref.shape[0], cb))
    c4 = jnp.broadcast_to(c4_ref[...], (c4_ref.shape[0], cb))

    # Static Python chunk loop -> one basic block: the LLO scheduler can
    # overlap chunk k's MXU matmuls with chunk k-1's tanh (EUP) / adds (VPU),
    # which occupy different VLIW slots.
    for c in range(n_chunks):
        lo, hi = c * cb, (c + 1) * cb
        xc = x_ref[:, lo:hi]                                     # (28,  cb) bf16
        a1 = jnp.tanh(mm(w1_ref, xc) + c1)                       # (128, cb) f32
        z2 = mm(w2_ref, a1) + c2                                 # (128, cb)
        h2 = jnp.tanh(z2[:64, :]) + z2[64:, :]                   # (64,  cb)
        z3 = mm(w3_ref, h2) + c3                                 # (32,  cb)
        a4 = jnp.tanh(jnp.tanh(z3[:16, :]) * p3 + z3[16:, :])    # (16,  cb)
        o_ref[:, lo:hi] = mm(w4_ref, a4) + c4                    # (9,   cb)


# ----------------------------- parameters ------------------------------------

def init_raw_params(key, input_size=INPUT_SIZE, num_classes=NUM_CLASSES):
    """Matches PyTorch _initialize_weights: Linear weights ~ N(0,1), biases 0;
    BatchNorm1d with fresh running stats (mean=0, var=1) and default affine."""
    keys = jax.random.split(key, 6)

    def linear(k, fin, fout):
        # stored as (in, out) so the math reads x @ W + b
        w = jax.random.normal(k, (fin, fout), dtype=jnp.float32)
        b = jnp.zeros((fout,), jnp.float32)
        return w, b

    def bn(features):
        gamma = jnp.ones((features,), jnp.float32)
        beta = jnp.zeros((features,), jnp.float32)
        mean = jnp.zeros((features,), jnp.float32)
        var = jnp.ones((features,), jnp.float32)
        scale = gamma / jnp.sqrt(var + BN_EPS)
        shift = beta - mean * scale
        return scale, shift

    raw = {}
    raw["w1"], raw["b1"] = linear(keys[0], input_size, 128)
    raw["s1"], raw["t1"] = bn(128)
    raw["w2"], raw["b2"] = linear(keys[1], 128, 64)
    raw["s2"], raw["t2"] = bn(64)
    raw["ws2"], raw["bs2"] = linear(keys[2], 128, 64)
    raw["w3"], raw["b3"] = linear(keys[3], 64, 16)
    raw["s3"], raw["t3"] = bn(16)
    raw["ws3"], raw["bs3"] = linear(keys[4], 64, 16)
    raw["w4"], raw["b4"] = linear(keys[5], 16, num_classes)
    return raw


def fuse_params(raw, matmul_dtype=jnp.bfloat16):
    """Fold every sigmoid affine and every eval-mode BN into feature-major fused
    weights so the kernel computes only matmul / tanh / add (+ one FMA).

    Identities used (all exact, f32 at fold time):
      sigmoid(z) = 0.5*tanh(0.5*z) + 0.5
      sigmoid(z)*s + t = tanh(0.5*z)*u + v,  u = 0.5*s, v = 0.5*s + t
      block+skip layers:  h = u*[tanh(0.5*z_blk) + (z_skip + v)/u]  (fold u into
      the next linear layer's rows; division guarded against gamma==0).
    """
    w1, b1 = raw["w1"], raw["b1"]
    s1, t1 = raw["s1"], raw["t1"]
    w2, b2, ws2, bs2 = raw["w2"], raw["b2"], raw["ws2"], raw["bs2"]
    s2, t2 = raw["s2"], raw["t2"]
    w3, b3, ws3, bs3 = raw["w3"], raw["b3"], raw["ws3"], raw["bs3"]
    s3, t3 = raw["s3"], raw["t3"]
    w4, b4 = raw["w4"], raw["b4"]

    u1, v1 = 0.5 * s1, 0.5 * s1 + t1
    u2, v2 = 0.5 * s2, 0.5 * s2 + t2
    u3, v3 = 0.5 * s3, 0.5 * s3 + t3

    # layer 1:  a1 = tanh(x @ (0.5*W1) + 0.5*b1);  h1 = a1*u1 + v1 (folded below)
    A1, c1 = 0.5 * w1, 0.5 * b1

    # layer 2 fused [block | skip/u2]; BN1 + sigmoid post-affine of h1 folded in.
    u2_safe = jnp.where(jnp.abs(u2) < 1e-12, 1.0, u2)
    A2 = jnp.concatenate([0.5 * w2, ws2 / u2_safe], axis=1)           # (128,128)
    c2 = jnp.concatenate([0.5 * b2, (bs2 + v2) / u2_safe], axis=0)    # (128,)
    c2 = c2 + v1 @ A2            # fold the +v1 part of h1 (pre-u1-scaled weights)
    A2 = u1[:, None] * A2        # fold the *u1 part of h1

    # layer 3 fused [block | skip]; BN2/post-affine (u2) folded as a row scale,
    # the final sigmoid's 0.5 pre-scale folded into both halves.
    A3 = u2[:, None] * jnp.concatenate([0.5 * w3, 0.5 * ws3], axis=1)  # (64,32)
    c3 = jnp.concatenate([0.5 * b3, 0.5 * (bs3 + v3)], axis=0)         # (32,)
    p3 = 0.5 * u3        # post-tanh per-feature scale (cannot fold: tanh follows)

    # layer 4:  out = tanh(0.5*h3) @ (0.5*W4) + (b4 + 0.5*sum_k W4[k,:])
    A4 = 0.5 * w4
    c4 = b4 + 0.5 * jnp.sum(w4, axis=0)

    col = lambda v: v.reshape(-1, 1).astype(jnp.float32)   # (F,1) column consts
    wt = lambda w: w.T.astype(matmul_dtype)                # feature-major (out,in)

    return (wt(A1), col(c1), wt(A2), col(c2),
            wt(A3), col(c3), col(p3), wt(A4), col(c4))


# ----------------------------- wrapper ----------------------------------------

def _pose_classifier_fm(xt, fused, *, tile_b):
    """Feature-major forward: xt (F_in, batch) bf16 -> (num_classes, batch) f32."""
    nfeat, batch = xt.shape
    nclass = fused[-1].shape[0]

    tb = batch if batch <= tile_b else tile_b
    grid = (pl.cdiv(batch, tb),)

    # Inner lane-chunking of the tile (>=2 chunks when possible) so MXU and
    # EUP/VPU work of adjacent chunks overlap.
    cb = tb
    for cand in (512, 256, 128):
        if tb % cand == 0 and tb // cand >= 2:
            cb = cand
            break
    n_chunks = tb // cb

    def param_spec(p):
        # Whole-array block, constant index -> VMEM-resident across grid steps.
        return pl.BlockSpec(p.shape, lambda i: (0, 0))

    in_specs = [pl.BlockSpec((nfeat, tb), lambda i: (0, i))]
    in_specs += [param_spec(p) for p in fused]
    out_spec = pl.BlockSpec((nclass, tb), lambda i: (0, i))

    kernel = functools.partial(pose_classifier_kernel, cb=cb, n_chunks=n_chunks)

    return pl.pallas_call(
        kernel,
        out_shape=jax.ShapeDtypeStruct((nclass, batch), jnp.float32),
        grid=grid,
        in_specs=in_specs,
        out_specs=out_spec,
        compiler_params=pltpu.CompilerParams(
            dimension_semantics=("parallel",),
            vmem_limit_bytes=32 * 1024 * 1024,
        ),
    )(xt, *fused)


def pose_classifier_forward(x, fused_params, *, tile_b=DEFAULT_TILE_B):
    """x: (batch, input_size) f32 -> (batch, num_classes) f32."""
    # Layout plumbing (cheap, wrapper-side): bf16 halves input HBM traffic; the
    # feature-major transpose makes every kernel intermediate lane-dense.
    xt = x.astype(jnp.bfloat16).T                       # (F_in, batch)
    out_t = _pose_classifier_fm(xt, fused_params, tile_b=tile_b)
    return out_t.T                                      # (batch, num_classes)


# ----------------------------- references -------------------------------------

def reference_fused(xt, fused):
    """Pure-JAX mirror of the kernel math (same fused params, same dtype policy)."""
    w1, c1, w2, c2, w3, c3, p3, w4, c4 = fused
    mm = lambda w, a: jnp.dot(w, a.astype(w.dtype),
                              preferred_element_type=jnp.float32)
    a1 = jnp.tanh(mm(w1, xt) + c1)
    z2 = mm(w2, a1) + c2
    h2 = jnp.tanh(z2[:64, :]) + z2[64:, :]
    z3 = mm(w3, h2) + c3
    a4 = jnp.tanh(jnp.tanh(z3[:16, :]) * p3 + z3[16:, :])
    return (mm(w4, a4) + c4).T


def reference_original(x, raw):
    """Original module structure (eval mode), full f32 math."""
    sg = jax.nn.sigmoid
    h1 = sg(x @ raw["w1"] + raw["b1"]) * raw["s1"] + raw["t1"]
    h2 = (sg(h1 @ raw["w2"] + raw["b2"]) * raw["s2"] + raw["t2"]
          + (h1 @ raw["ws2"] + raw["bs2"]))
    h3 = (sg(h2 @ raw["w3"] + raw["b3"]) * raw["s3"] + raw["t3"]
          + (h2 @ raw["ws3"] + raw["bs3"]))
    return sg(h3) @ raw["w4"] + raw["b4"]


# ----------------------------- demo / checks ----------------------------------

if __name__ == "__main__":
    key = jax.random.PRNGKey(0)
    k_x, k_p = jax.random.split(key)

    batch = 256   # small, but enough lanes to exercise the multi-chunk path
    x = jax.random.normal(k_x, (batch, INPUT_SIZE), dtype=jnp.float32)
    raw = init_raw_params(k_p)
    fused = fuse_params(raw, matmul_dtype=jnp.bfloat16)

    out = jax.block_until_ready(pose_classifier_forward(x, fused))
    assert out.shape == (batch, NUM_CLASSES), out.shape

    # (1) Kernel vs pure-JAX mirror with identical fused params / dtype policy:
    #     only MXU-vs-XLA accumulation-order noise should remain.
    xt = x.astype(jnp.bfloat16).T
    ref_mirror = reference_fused(xt, fused)
    mirror_dev = float(jnp.max(jnp.abs(out - ref_mirror)))
    assert jnp.allclose(out, ref_mirror, atol=1e-1, rtol=1e-1), mirror_dev

    # (2) Sanity check vs exact f32 original-module semantics: a structural bug
    #     (wrong fold, missing skip, bad slice) gives O(10+) deviations; bf16
    #     input/weight quantization through the unscaled N(0,1) weights stays
    #     well below this threshold.
    ref_exact = reference_original(x, raw)
    max_dev = float(jnp.max(jnp.abs(out - ref_exact)))
    assert max_dev < 2.0, max_dev

    print("KERNEL_OK")
</pallas_src>

<mosaic_0001>
module attributes {stable_mosaic.version = 11 : i64} {
  func.func @pose_classifier_kernel(%arg0: i32, %arg1: memref<28x256xbf16, #tpu.memory_space<vmem>>, %arg2: memref<128x28xbf16, #tpu.memory_space<vmem>>, %arg3: memref<128x1xf32, #tpu.memory_space<vmem>>, %arg4: memref<128x128xbf16, #tpu.memory_space<vmem>>, %arg5: memref<128x1xf32, #tpu.memory_space<vmem>>, %arg6: memref<32x64xbf16, #tpu.memory_space<vmem>>, %arg7: memref<32x1xf32, #tpu.memory_space<vmem>>, %arg8: memref<16x1xf32, #tpu.memory_space<vmem>>, %arg9: memref<9x16xbf16, #tpu.memory_space<vmem>>, %arg10: memref<9x1xf32, #tpu.memory_space<vmem>>, %arg11: memref<9x256xf32, #tpu.memory_space<vmem>>) attributes {dimension_semantics = [#tpu.dimension_semantics<parallel>], iteration_bounds = array<i64: 1>, scalar_prefetch = 0 : i64, scratch_operands = 0 : i64, tpu.core_type = #tpu.core_type<tc>, window_params = [{transform_indices = @transform_0, window_bounds = array<i64: 28, 256>}, {pipeline_mode = #tpu.pipeline_mode<synchronous>, transform_indices = @transform_1, window_bounds = array<i64: 128, 28>}, {pipeline_mode = #tpu.pipeline_mode<synchronous>, transform_indices = @transform_2, window_bounds = array<i64: 128, 1>}, {pipeline_mode = #tpu.pipeline_mode<synchronous>, transform_indices = @transform_3, window_bounds = array<i64: 128, 128>}, {pipeline_mode = #tpu.pipeline_mode<synchronous>, transform_indices = @transform_4, window_bounds = array<i64: 128, 1>}, {pipeline_mode = #tpu.pipeline_mode<synchronous>, transform_indices = @transform_5, window_bounds = array<i64: 32, 64>}, {pipeline_mode = #tpu.pipeline_mode<synchronous>, transform_indices = @transform_6, window_bounds = array<i64: 32, 1>}, {pipeline_mode = #tpu.pipeline_mode<synchronous>, transform_indices = @transform_7, window_bounds = array<i64: 16, 1>}, {pipeline_mode = #tpu.pipeline_mode<synchronous>, transform_indices = @transform_8, window_bounds = array<i64: 9, 16>}, {pipeline_mode = #tpu.pipeline_mode<synchronous>, transform_indices = @transform_9, window_bounds = array<i64: 9, 1>}, {transform_indices = @transform_10, window_bounds = array<i64: 9, 256>}]} {
    %c0 = arith.constant 0 : index
    %c0_0 = arith.constant 0 : index
    %0 = vector.load %arg3[%c0, %c0_0] : memref<128x1xf32, #tpu.memory_space<vmem>>, vector<128x1xf32>
    %1 = vector.shape_cast %0 : vector<128x1xf32> to vector<128x1xf32>
    %2 = vector.broadcast %1 : vector<128x1xf32> to vector<128x128xf32>
    %c0_1 = arith.constant 0 : index
    %c0_2 = arith.constant 0 : index
    %3 = vector.load %arg5[%c0_1, %c0_2] : memref<128x1xf32, #tpu.memory_space<vmem>>, vector<128x1xf32>
    %4 = vector.shape_cast %3 : vector<128x1xf32> to vector<128x1xf32>
    %5 = vector.broadcast %4 : vector<128x1xf32> to vector<128x128xf32>
    %c0_3 = arith.constant 0 : index
    %c0_4 = arith.constant 0 : index
    %6 = vector.load %arg7[%c0_3, %c0_4] : memref<32x1xf32, #tpu.memory_space<vmem>>, vector<32x1xf32>
    %7 = vector.shape_cast %6 : vector<32x1xf32> to vector<32x1xf32>
    %8 = vector.broadcast %7 : vector<32x1xf32> to vector<32x128xf32>
    %c0_5 = arith.constant 0 : index
    %c0_6 = arith.constant 0 : index
    %9 = vector.load %arg8[%c0_5, %c0_6] : memref<16x1xf32, #tpu.memory_space<vmem>>, vector<16x1xf32>
    %10 = vector.shape_cast %9 : vector<16x1xf32> to vector<16x1xf32>
    %11 = vector.broadcast %10 : vector<16x1xf32> to vector<16x128xf32>
    %c0_7 = arith.constant 0 : index
    %c0_8 = arith.constant 0 : index
    %12 = vector.load %arg10[%c0_7, %c0_8] : memref<9x1xf32, #tpu.memory_space<vmem>>, vector<9x1xf32>
    %13 = vector.shape_cast %12 : vector<9x1xf32> to vector<9x1xf32>
    %14 = vector.broadcast %13 : vector<9x1xf32> to vector<9x128xf32>
    %c0_9 = arith.constant 0 : index
    %c0_10 = arith.constant 0 : index
    %15 = vector.load %arg1[%c0_9, %c0_10] : memref<28x256xbf16, #tpu.memory_space<vmem>>, vector<28x128xbf16>
    %c0_11 = arith.constant 0 : index
    %c0_12 = arith.constant 0 : index
    %16 = vector.load %arg2[%c0_11, %c0_12] : memref<128x28xbf16, #tpu.memory_space<vmem>>, vector<128x28xbf16>
    %cst = arith.constant dense<0.000000e+00> : vector<128x128xf32>
    %17 = tpu.matmul %16, %15, %cst {dimension_numbers = #tpu.dot_dimension_numbers<[1], [0], [0], [1], [0, 0, 1, 1], [], []>} : vector<128x28xbf16>, vector<28x128xbf16>, vector<128x128xf32> -> vector<128x128xf32>
    %18 = arith.addf %17, %2 : vector<128x128xf32>
    %19 = math.tanh %18 : vector<128x128xf32>
    %c0_13 = arith.constant 0 : index
    %c0_14 = arith.constant 0 : index
    %20 = vector.load %arg4[%c0_13, %c0_14] : memref<128x128xbf16, #tpu.memory_space<vmem>>, vector<128x128xbf16>
    %21 = arith.truncf %19 : vector<128x128xf32> to vector<128x128xbf16>
    %cst_15 = arith.constant dense<0.000000e+00> : vector<128x128xf32>
    %22 = tpu.matmul %20, %21, %cst_15 {dimension_numbers = #tpu.dot_dimension_numbers<[1], [0], [0], [1], [0, 0, 1, 1], [], []>} : vector<128x128xbf16>, vector<128x128xbf16>, vector<128x128xf32> -> vector<128x128xf32>
    %23 = arith.addf %22, %5 : vector<128x128xf32>
    %24 = vector.extract_strided_slice %23 {offsets = [0, 0], sizes = [64, 128], strides = [1, 1]} : vector<128x128xf32> to vector<64x128xf32>
    %25 = math.tanh %24 : vector<64x128xf32>
    %26 = vector.extract_strided_slice %23 {offsets = [64, 0], sizes = [64, 128], strides = [1, 1]} : vector<128x128xf32> to vector<64x128xf32>
    %27 = arith.addf %25, %26 : vector<64x128xf32>
    %c0_16 = arith.constant 0 : index
    %c0_17 = arith.constant 0 : index
    %28 = vector.load %arg6[%c0_16, %c0_17] : memref<32x64xbf16, #tpu.memory_space<vmem>>, vector<32x64xbf16>
    %29 = arith.truncf %27 : vector<64x128xf32> to vector<64x128xbf16>
    %cst_18 = arith.constant dense<0.000000e+00> : vector<32x128xf32>
    %30 = tpu.matmul %28, %29, %cst_18 {dimension_numbers = #tpu.dot_dimension_numbers<[1], [0], [0], [1], [0, 0, 1, 1], [], []>} : vector<32x64xbf16>, vector<64x128xbf16>, vector<32x128xf32> -> vector<32x128xf32>
    %31 = arith.addf %30, %8 : vector<32x128xf32>
    %32 = vector.extract_strided_slice %31 {offsets = [0, 0], sizes = [16, 128], strides = [1, 1]} : vector<32x128xf32> to vector<16x128xf32>
    %33 = math.tanh %32 : vector<16x128xf32>
    %34 = arith.mulf %33, %11 : vector<16x128xf32>
    %35 = vector.extract_strided_slice %31 {offsets = [16, 0], sizes = [16, 128], strides = [1, 1]} : vector<32x128xf32> to vector<16x128xf32>
    %36 = arith.addf %34, %35 : vector<16x128xf32>
    %37 = math.tanh %36 : vector<16x128xf32>
    %c0_19 = arith.constant 0 : index
    %c0_20 = arith.constant 0 : index
    %38 = vector.load %arg9[%c0_19, %c0_20] : memref<9x16xbf16, #tpu.memory_space<vmem>>, vector<9x16xbf16>
    %39 = arith.truncf %37 : vector<16x128xf32> to vector<16x128xbf16>
    %cst_21 = arith.constant dense<0.000000e+00> : vector<9x128xf32>
    %40 = tpu.matmul %38, %39, %cst_21 {dimension_numbers = #tpu.dot_dimension_numbers<[1], [0], [0], [1], [0, 0, 1, 1], [], []>} : vector<9x16xbf16>, vector<16x128xbf16>, vector<9x128xf32> -> vector<9x128xf32>
    %41 = arith.addf %40, %14 : vector<9x128xf32>
    %c0_22 = arith.constant 0 : index
    %c0_23 = arith.constant 0 : index
    %42 = vector.load %arg11[%c0_22, %c0_23] : memref<9x256xf32, #tpu.memory_space<vmem>>, vector<9x128xf32>
    tpu.vector_store %arg11[%c0_22, %c0_23], %41 {strides = array<i32>} : memref<9x256xf32, #tpu.memory_space<vmem>>, vector<9x128xf32>,
    %c0_24 = arith.constant 0 : index
    %c128 = arith.constant 128 : index
    %43 = vector.load %arg1[%c0_24, %c128] : memref<28x256xbf16, #tpu.memory_space<vmem>>, vector<28x128xbf16>
    %c0_25 = arith.constant 0 : index
    %c0_26 = arith.constant 0 : index
    %44 = vector.load %arg2[%c0_25, %c0_26] : memref<128x28xbf16, #tpu.memory_space<vmem>>, vector<128x28xbf16>
    %cst_27 = arith.constant dense<0.000000e+00> : vector<128x128xf32>
    %45 = tpu.matmul %44, %43, %cst_27 {dimension_numbers = #tpu.dot_dimension_numbers<[1], [0], [0], [1], [0, 0, 1, 1], [], []>} : vector<128x28xbf16>, vector<28x128xbf16>, vector<128x128xf32> -> vector<128x128xf32>
    %46 = arith.addf %45, %2 : vector<128x128xf32>
    %47 = math.tanh %46 : vector<128x128xf32>
    %c0_28 = arith.constant 0 : index
    %c0_29 = arith.constant 0 : index
    %48 = vector.load %arg4[%c0_28, %c0_29] : memref<128x128xbf16, #tpu.memory_space<vmem>>, vector<128x128xbf16>
    %49 = arith.truncf %47 : vector<128x128xf32> to vector<128x128xbf16>
    %cst_30 = arith.constant dense<0.000000e+00> : vector<128x128xf32>
    %50 = tpu.matmul %48, %49, %cst_30 {dimension_numbers = #tpu.dot_dimension_numbers<[1], [0], [0], [1], [0, 0, 1, 1], [], []>} : vector<128x128xbf16>, vector<128x128xbf16>, vector<128x128xf32> -> vector<128x128xf32>
    %51 = arith.addf %50, %5 : vector<128x128xf32>
    %52 = vector.extract_strided_slice %51 {offsets = [0, 0], sizes = [64, 128], strides = [1, 1]} : vector<128x128xf32> to vector<64x128xf32>
    %53 = math.tanh %52 : vector<64x128xf32>
    %54 = vector.extract_strided_slice %51 {offsets = [64, 0], sizes = [64, 128], strides = [1, 1]} : vector<128x128xf32> to vector<64x128xf32>
    %55 = arith.addf %53, %54 : vector<64x128xf32>
    %c0_31 = arith.constant 0 : index
    %c0_32 = arith.constant 0 : index
    %56 = vector.load %arg6[%c0_31, %c0_32] : memref<32x64xbf16, #tpu.memory_space<vmem>>, vector<32x64xbf16>
    %57 = arith.truncf %55 : vector<64x128xf32> to vector<64x128xbf16>
    %cst_33 = arith.constant dense<0.000000e+00> : vector<32x128xf32>
    %58 = tpu.matmul %56, %57, %cst_33 {dimension_numbers = #tpu.dot_dimension_numbers<[1], [0], [0], [1], [0, 0, 1, 1], [], []>} : vector<32x64xbf16>, vector<64x128xbf16>, vector<32x128xf32> -> vector<32x128xf32>
    %59 = arith.addf %58, %8 : vector<32x128xf32>
    %60 = vector.extract_strided_slice %59 {offsets = [0, 0], sizes = [16, 128], strides = [1, 1]} : vector<32x128xf32> to vector<16x128xf32>
    %61 = math.tanh %60 : vector<16x128xf32>
    %62 = arith.mulf %61, %11 : vector<16x128xf32>
    %63 = vector.extract_strided_slice %59 {offsets = [16, 0], sizes = [16, 128], strides = [1, 1]} : vector<32x128xf32> to vector<16x128xf32>
    %64 = arith.addf %62, %63 : vector<16x128xf32>
    %65 = math.tanh %64 : vector<16x128xf32>
    %c0_34 = arith.constant 0 : index
    %c0_35 = arith.constant 0 : index
    %66 = vector.load %arg9[%c0_34, %c0_35] : memref<9x16xbf16, #tpu.memory_space<vmem>>, vector<9x16xbf16>
    %67 = arith.truncf %65 : vector<16x128xf32> to vector<16x128xbf16>
    %cst_36 = arith.constant dense<0.000000e+00> : vector<9x128xf32>
    %68 = tpu.matmul %66, %67, %cst_36 {dimension_numbers = #tpu.dot_dimension_numbers<[1], [0], [0], [1], [0, 0, 1, 1], [], []>} : vector<9x16xbf16>, vector<16x128xbf16>, vector<9x128xf32> -> vector<9x128xf32>
    %69 = arith.addf %68, %14 : vector<9x128xf32>
    %c0_37 = arith.constant 0 : index
    %c128_38 = arith.constant 128 : index
    %70 = vector.load %arg11[%c0_37, %c128_38] : memref<9x256xf32, #tpu.memory_space<vmem>>, vector<9x128xf32>
    tpu.vector_store %arg11[%c0_37, %c128_38], %69 {strides = array<i32>} : memref<9x256xf32, #tpu.memory_space<vmem>>, vector<9x128xf32>,
    return
  }
  func.func @transform_0(%arg0: i32) -> (i32, i32) {
    %c0_i32 = arith.constant 0 : i32
    %c0_i32_0 = arith.constant 0 : i32
    return %c0_i32, %arg0 : i32, i32
  }
  func.func @transform_1(%arg0: i32) -> (i32, i32) {
    %c0_i32 = arith.constant 0 : i32
    %c0_i32_0 = arith.constant 0 : i32
    %c0_i32_1 = arith.constant 0 : i32
    return %c0_i32, %c0_i32_0 : i32, i32
  }
  func.func @transform_2(%arg0: i32) -> (i32, i32) {
    %c0_i32 = arith.constant 0 : i32
    %c0_i32_0 = arith.constant 0 : i32
    %c0_i32_1 = arith.constant 0 : i32
    return %c0_i32, %c0_i32_0 : i32, i32
  }
  func.func @transform_3(%arg0: i32) -> (i32, i32) {
    %c0_i32 = arith.constant 0 : i32
    %c0_i32_0 = arith.constant 0 : i32
    %c0_i32_1 = arith.constant 0 : i32
    return %c0_i32, %c0_i32_0 : i32, i32
  }
  func.func @transform_4(%arg0: i32) -> (i32, i32) {
    %c0_i32 = arith.constant 0 : i32
    %c0_i32_0 = arith.constant 0 : i32
    %c0_i32_1 = arith.constant 0 : i32
    return %c0_i32, %c0_i32_0 : i32, i32
  }
  func.func @transform_5(%arg0: i32) -> (i32, i32) {
    %c0_i32 = arith.constant 0 : i32
    %c0_i32_0 = arith.constant 0 : i32
    %c0_i32_1 = arith.constant 0 : i32
    return %c0_i32, %c0_i32_0 : i32, i32
  }
  func.func @transform_6(%arg0: i32) -> (i32, i32) {
    %c0_i32 = arith.constant 0 : i32
    %c0_i32_0 = arith.constant 0 : i32
    %c0_i32_1 = arith.constant 0 : i32
    return %c0_i32, %c0_i32_0 : i32, i32
  }
  func.func @transform_7(%arg0: i32) -> (i32, i32) {
    %c0_i32 = arith.constant 0 : i32
    %c0_i32_0 = arith.constant 0 : i32
    %c0_i32_1 = arith.constant 0 : i32
    return %c0_i32, %c0_i32_0 : i32, i32
  }
  func.func @transform_8(%arg0: i32) -> (i32, i32) {
    %c0_i32 = arith.constant 0 : i32
    %c0_i32_0 = arith.constant 0 : i32
    %c0_i32_1 = arith.constant 0 : i32
    return %c0_i32, %c0_i32_0 : i32, i32
  }
  func.func @transform_9(%arg0: i32) -> (i32, i32) {
    %c0_i32 = arith.constant 0 : i32
    %c0_i32_0 = arith.constant 0 : i32
    %c0_i32_1 = arith.constant 0 : i32
    return %c0_i32, %c0_i32_0 : i32, i32
  }
  func.func @transform_10(%arg0: i32) -> (i32, i32) {
    %c0_i32 = arith.constant 0 : i32
    %c0_i32_0 = arith.constant 0 : i32
    return %c0_i32, %arg0 : i32, i32
  }
}

</mosaic_0001>

<bundles_post_ra>
// kernel: tpu_custom_call.1
= control target key start
LH: loop header
LB: loop body
LE: loop exit
PB: predicated region body
PF: predicated region fallthrough
CT: control target
= control target key end

     0   :  { %vm373_vm0 = vcmask 1045504   ;;  %vm348_vm1 = vcmask 228352   ;;  %v1819_v5 = vmov 0   ;;  %s2330_s0 = inlined_call_operand.vmem [shape: bf16[28,256], index: 0, kind: input, shape index: {}]   ;;  %s2331_s1 = inlined_call_operand.vmem [shape: bf16[128,28], index: 1, kind: input, shape index: {}]   ;;  %s2332_s2 = inlined_call_operand.vmem [shape: f32[128,1], index: 2, kind: input, shape index: {}]   ;;  %s2333_s3 = inlined_call_operand.vmem [shape: bf16[128,128], index: 3, kind: input, shape index: {}]   ;;  %s2334_s4 = inlined_call_operand.vmem [shape: f32[128,1], index: 4, kind: input, shape index: {}]   ;;  %s2335_s5 = inlined_call_operand.vmem [shape: bf16[32,64], index: 5, kind: input, shape index: {}]   ;;  %s2336_s6 = inlined_call_operand.vmem [shape: f32[32,1], index: 6, kind: input, shape index: {}]   ;;  %s2337_s7 = inlined_call_operand.vmem [shape: f32[16,1], index: 7, kind: input, shape index: {}]   ;;  %s2338_s8 = inlined_call_operand.vmem [shape: bf16[9,16], index: 8, kind: input, shape index: {}]   ;;  %s2339_s9 = inlined_call_operand.vmem [shape: f32[9,1], index: 9, kind: input, shape index: {}]   ;;  %s2340_s10 = inlined_call_operand.hbm [shape: f32[9,256], index: 10, kind: output, shape index: {}]  }
   0x1   :  { %v1641_v0 = vld [vmem:[%s2330_s0] ss:$8 sps:$4 sm:$0xff]   ;;  %v1642_v2 = vld [vmem:[%s2330_s0 + $0x10] ss:$8 sps:$4 sm:$0x3f]   ;;  %1639 = vset.pattern.permute.xlu0 %v1819_v5  ;;  %1640 = vset.pattern.permute.xlu1 %v1819_v5 }
   0x2   :  { %v1643_v1 = vld [vmem:[%s2331_s1] sm:$0xff]   ;;  %1491 = vmatprep.subr.bf16.mxu0 %v1641_v0  ;;  %v375_v3 = vsel %vm373_vm0, %v1642_v2, 0  ;;  %v1644_v4 = vld [vmem:[%s2331_s1 + $0x8] sm:$0xff]   ;;  %v1645_v7 = vld [vmem:[%s2331_s1 + $0x10] sm:$0xff]  }
   0x3   :  { %1492 = vmatpush3.bf16.msra.mxu0 %v1641_v0  ;;  %1495 = vmatprep.mubr.msk.bf16.mxu0 %vm348_vm1, %v1643_v1  ;;  %v37_v6 = vld [vmem:[%s2332_s2] sm:$0xff]  ;;  %v39_v8 = vld [vmem:[%s2332_s2 + $0x10] sm:$0xff]  ;;  %v38_v9 = vld [vmem:[%s2332_s2 + $0x8] sm:$0xff] }
   0x4   :  { %1631 = vmatprep.subr.msk.bf16.mxu0 %vm373_vm0, %v1642_v2  ;;  %55 = vperm.xlu0 %1639, %v37_v6   ;;  %v40_v10 = vld [vmem:[%s2332_s2 + $0x18] sm:$0xff]  ;;  %v41_v11 = vld [vmem:[%s2332_s2 + $0x20] sm:$0xff]  ;;  %v42_v12 = vld [vmem:[%s2332_s2 + $0x28] sm:$0xff] }
   0x5   :  { %65 = vperm.xlu1 %1640, %v39_v8   ;;  %v1646_v13 = vld [vmem:[%s2331_s1 + $0x18] sm:$0xff]   ;;  %v1647_v14 = vld [vmem:[%s2331_s1 + $0x20] sm:$0xff]   ;;  %v43_v15 = vld [vmem:[%s2332_s2 + $0x30] sm:$0xff] }
   0x6   :  { %v44_v16 = vld [vmem:[%s2332_s2 + $0x38] sm:$0xff]  ;;  %v45_v17 = vld [vmem:[%s2332_s2 + $0x40] sm:$0xff]  ;;  %v46_v18 = vld [vmem:[%s2332_s2 + $0x48] sm:$0xff] }
   0x7   :  { %1494 = vmatpush3.bf16.msra.mxu0 %v375_v3  ;;  %v1648_v19 = vld [vmem:[%s2331_s1 + $0x28] sm:$0xff]   ;;  %v1649_v20 = vld [vmem:[%s2331_s1 + $0x30] sm:$0xff]   ;;  %v48_v22 = vld [vmem:[%s2332_s2 + $0x58] sm:$0xff] }
   0x8   :  { %60 = vperm.xlu0 %1639, %v38_v9   ;;  %v47_v21 = vld [vmem:[%s2332_s2 + $0x50] sm:$0xff]  ;;  %v49_v23 = vld [vmem:[%s2332_s2 + $0x60] sm:$0xff]  ;;  %v50_v24 = vld [vmem:[%s2332_s2 + $0x68] sm:$0xff] }
   0x9   :  { %70 = vperm.xlu1 %1640, %v40_v10   ;;  %v1650_v25 = vld [vmem:[%s2331_s1 + $0x38] sm:$0xff]   ;;  %v51_v26 = vld [vmem:[%s2332_s2 + $0x70] sm:$0xff]  ;;  %v133_v28 = vld [vmem:[%s2334_s4] sm:$0xff] }
   0xa   :  { %1496 = vmatmul.mubr.msk.bf16.vlgmr.msra.gmra.mrb[0].mxu0 %vm348_vm1, %v1644_v4  ;;  %v52_v27 = vld [vmem:[%s2332_s2 + $0x78] sm:$0xff]  ;;  %v134_v29 = vld [vmem:[%s2334_s4 + $0x8] sm:$0xff]  ;;  %v135_v30 = vld [vmem:[%s2334_s4 + $0x10] sm:$0xff] }
   0xb   :  { %1499 = vmatprep.mubr.msk.bf16.mxu0 %vm348_vm1, %v1645_v7  ;;  %v136_v31 = vld [vmem:[%s2334_s4 + $0x18] sm:$0xff]  ;;  %v137_v32 = vld [vmem:[%s2334_s4 + $0x20] sm:$0xff]  ;;  %v138_v33 = vld [vmem:[%s2334_s4 + $0x28] sm:$0xff] }
   0xc   :  { %75 = vperm.xlu0 %1639, %v41_v11  }
   0xd   :  { %80 = vperm.xlu1 %1640, %v42_v12  }
  0x10   :  { %85 = vperm.xlu0 %1639, %v43_v15  }
  0x11   :  { %90 = vperm.xlu1 %1640, %v44_v16  }
  0x12   :  { %1500 = vmatmul.mubr.msk.bf16.gmra.mrb[4].mxu0 %vm348_vm1, %v1646_v13 }
  0x13   :  { %1503 = vmatprep.mubr.msk.bf16.mxu0 %vm348_vm1, %v1647_v14 }
  0x14   :  { %95 = vperm.xlu0 %1639, %v45_v17  }
  0x15   :  { %100 = vperm.xlu1 %1640, %v46_v18  }
  0x18   :  { %105 = vperm.xlu0 %1639, %v47_v21  }
  0x19   :  { %110 = vperm.xlu1 %1640, %v48_v22  }
  0x1a   :  { %1504 = vmatmul.mubr.msk.bf16.gmra.mrb[8].mxu0 %vm348_vm1, %v1648_v19 }
  0x1b   :  { %1507 = vmatprep.mubr.msk.bf16.mxu0 %vm348_vm1, %v1649_v20 }
  0x1c   :  { %115 = vperm.xlu0 %1639, %v49_v23  }
  0x1d   :  { %120 = vperm.xlu1 %1640, %v50_v24  }
  0x20   :  { %125 = vperm.xlu0 %1639, %v51_v26  }
  0x21   :  { %130 = vperm.xlu1 %1640, %v52_v27  }
  0x22   :  { %1508 = vmatmul.mubr.msk.bf16.gmra.mrb[12].mxu0 %vm348_vm1, %v1650_v25 }
  0x24   :  { %151 = vperm.xlu0 %1639, %v133_v28  }
  0x25   :  { %156 = vperm.xlu1 %1640, %v134_v29  }
  0x28   :  { %161 = vperm.xlu0 %1639, %v135_v30  }
  0x29   :  { %166 = vperm.xlu1 %1640, %v136_v31  }
  0x2a   :  { %15 = vsyncpa [#allocation3], 0  ;;  %v141_v34 = vld [vmem:[%s2334_s4 + $0x40] sm:$0xff]  ;;  %v142_v35 = vld [vmem:[%s2334_s4 + $0x48] sm:$0xff]  ;;  %vm693_vm2 = vcmask 523264   ;;  %vm1821_vm3 = vmmov 0  }
  0x2b   :  { %v139_v36 = vld [vmem:[%s2334_s4 + $0x30] sm:$0xff]  ;;  %v140_v37 = vld [vmem:[%s2334_s4 + $0x38] sm:$0xff]  ;;  %v145_v40 = vld [vmem:[%s2334_s4 + $0x60] sm:$0xff]  ;;  %vm765_vm4 = vcmask 130048   ;;  %s1822_s15 = smov [#allocation2]  }
  0x2c   :  { %171 = vperm.xlu0 %1639, %v137_v32   ;;  %v143_v38 = vld [vmem:[%s2334_s4 + $0x50] sm:$0xff]  ;;  %v144_v39 = vld [vmem:[%s2334_s4 + $0x58] sm:$0xff]  ;;  %v146_v41 = vld [vmem:[%s2334_s4 + $0x68] sm:$0xff]  ;;  %s1348_s16 = sshll.u32 %s1822_s15, 4  ;;  %s1349_s16 = int_to_ptr.vmem [resolvable:$true] %s1348_s16 }
  0x2d   :  { %176 = vperm.xlu1 %1640, %v138_v33   ;;  %v147_v42 = vld [vmem:[%s2334_s4 + $0x70] sm:$0xff]  ;;  %v148_v43 = vld [vmem:[%s2334_s4 + $0x78] sm:$0xff]  ;;  %v229_v44 = vld [vmem:[%s2336_s6] sm:$0xff]  ;;  %s1795_s17 = scalar_lea.vmem %s1349_s16, 512  ;;  %p1800_p1 = scmp.lt.s32.totalorder %s1349_s16, %s1349_s16 }
  0x2e   :  { %v230_v45 = vld [vmem:[%s2336_s6 + $0x8] sm:$0xff]  ;;  %v231_v46 = vld [vmem:[%s2336_s6 + $0x10] sm:$0xff]  ;;  %v232_v47 = vld [vmem:[%s2336_s6 + $0x18] sm:$0xff]  ;;  %p1796_p0 = scmp.ne.s32.totalorder %s1349_s16, %s1795_s17  ;;  %p1801_p2 = scmp.lt.s32.totalorder %s1795_s17, %s1795_s17 }
  0x2f   :  { %v253_v48 = vld [vmem:[%s2337_s7] sm:$0xff]  ;;  %v254_v49 = vld [vmem:[%s2337_s7 + $0x8] sm:$0xff] }
  0x30   :  { %191 = vperm.xlu0 %1639, %v141_v34   ;;  %v265_v50 = vld [vmem:[%s2339_s9] sm:$0xff]  ;;  %v266_v51 = vld [vmem:[%s2339_s9 + $0x8] sm:$0x1]  ;;  %p1802_p3 = por %p1801_p2, %p1800_p1 }
  0x31   :  { %196 = vperm.xlu1 %1640, %v142_v35   ;;  %v1651_v52 = vld [vmem:[%s2333_s3] sm:$0xff]  }
  0x32   :  { %1527 = vmatprep.mubr.bf16.mxu1 %v1651_v52  ;;  %p1803_p4 = pnand %p1802_p3, %p1796_p0 }
  0x34   :  { %181 = vperm.xlu0 %1639, %v139_v36  }
  0x35   :  { %186 = vperm.xlu1 %1640, %v140_v37  }
  0x38   :  { %201 = vperm.xlu0 %1639, %v143_v38  }
  0x39   :  { %206 = vperm.xlu1 %1640, %v144_v39  }
  0x3c   :  { %211 = vperm.xlu0 %1639, %v145_v40  }
  0x3d   :  { %216 = vperm.xlu1 %1640, %v146_v41  }
  0x40   :  { %221 = vperm.xlu0 %1639, %v147_v42  }
  0x41   :  { %226 = vperm.xlu1 %1640, %v148_v43  }
  0x44   :  { %235 = vperm.xlu0 %1639, %v229_v44  }
  0x45   :  { %240 = vperm.xlu1 %1640, %v230_v45  }
  0x48   :  { %245 = vperm.xlu0 %1639, %v231_v46  }
  0x49   :  { %250 = vperm.xlu1 %1640, %v232_v47  }
  0x4c   :  { %257 = vperm.xlu0 %1639, %v253_v48  }
  0x4d   :  { %262 = vperm.xlu1 %1640, %v254_v49  }
  0x50   :  { %269 = vperm.xlu0 %1639, %v265_v50  }
  0x51   :  { %274 = vperm.xlu1 %1640, %v266_v51  }
  0x83   :  { %v2043_v53 = vpop.permute.xlu0 %55 }
  0x84   :  { %v2045_v54 = vpop.permute.xlu1 %65 }
  0x87   :  { %v2047_v55 = vpop.permute.xlu0 %60 }
  0x88   :  { %v2049_v56 = vpop.permute.xlu1 %70 }
  0x8b   :  { %v2051_v57 = vpop.permute.xlu0 %75 }
  0x8c   :  { %v2053_v58 = vpop.permute.xlu1 %80 }
  0x8f   :  { %v2055_v59 = vpop.permute.xlu0 %85 }
  0x90   :  { %v2058_v63 = vpop.permute.xlu1 %90 }
  0x93   :  { %v2063_v5 = vpop.permute.xlu0 %95 }
  0x94   :  { %v2065_v6 = vpop.permute.xlu1 %100 }
  0x97   :  { %v2070_v14 = vpop.permute.xlu0 %105 }
  0x98   :  { %v2073_v18 = vpop.permute.xlu1 %110 }
  0x9b   :  { %v2076_v26 = vpop.permute.xlu0 %115 }
  0x9c   :  { %v2080_v31 = vpop.permute.xlu1 %120 }
  0x9f   :  { %v2083_v37 = vpop.permute.xlu0 %125 }
  0xa0   :  { %v2086_v43 = vpop.permute.xlu1 %130 }
  0xdd   :  { %v1497_v60 = vpop.f32.mrb[0].mxu0 }
  0xde   :  { %v420_v61 = vadd.f32 %v1497_v60, %v2045_v54  ;;  %v411_v62 = vpop.f32.mrb[1].mxu0 }
  0xdf   :  { %v412_v0 = vadd.f32 %v411_v62, %v2043_v53  ;;  %v1498_v1 = vpop.f32.mrb[2].mxu0 }
  0xe0   :  { %1683 = vtanh.f32 %v420_v61  ;;  %v423_v2 = vadd.f32 %v1498_v1, %v2049_v56  ;;  %v414_v3 = vpop.f32.mrb[3].mxu0 }
  0xe1   :  { %1685 = vtanh.f32 %v412_v0  ;;  %v415_v4 = vadd.f32 %v414_v3, %v2047_v55 }
  0xe2   :  { %1687 = vtanh.f32 %v423_v2 }
  0xe3   :  { %1689 = vtanh.f32 %v415_v4 }
  0xe5   :  { %v1501_v7 = vpop.f32.mrb[4].mxu0 }
  0xe6   :  { %v436_v8 = vadd.f32 %v1501_v7, %v2055_v59  ;;  %v427_v9 = vpop.f32.mrb[5].mxu0  ;;  %v1652_v7 = vld [vmem:[%s2333_s3 + $0x8] sm:$0xff]  }
  0xe7   :  { %v428_v10 = vadd.f32 %v427_v9, %v2051_v57  ;;  %v1502_v11 = vpop.f32.mrb[6].mxu0  ;;  %v1654_v9 = vld [vmem:[%s2333_s3 + $0x18] sm:$0xff]  }
  0xe8   :  { %1691 = vtanh.f32 %v436_v8  ;;  %v439_v12 = vadd.f32 %v1502_v11, %v2058_v63  ;;  %v430_v13 = vpop.f32.mrb[7].mxu0  ;;  %v1653_v8 = vld [vmem:[%s2333_s3 + $0x10] sm:$0xff]   ;;  %v1656_v11 = vld [vmem:[%s2333_s3 + $0x28] sm:$0xff]  }
  0xe9   :  { %1693 = vtanh.f32 %v428_v10  ;;  %v431_v15 = vadd.f32 %v430_v13, %v2053_v58  ;;  %v1655_v10 = vld [vmem:[%s2333_s3 + $0x20] sm:$0xff]   ;;  %v1658_v13 = vld [vmem:[%s2333_s3 + $0x38] sm:$0xff]  }
  0xea   :  { %v1684_v16 = vpop.eup %1683  ;;  %1695 = vtanh.f32 %v439_v12  ;;  %v1657_v12 = vld [vmem:[%s2333_s3 + $0x30] sm:$0xff]  }
  0xeb   :  { %v1686_v17 = vpop.eup %1685  ;;  %1697 = vtanh.f32 %v431_v15  ;;  %v1659_v15 = vld [vmem:[%s2335_s5] sm:$0xff]  }
  0xec   :  { %v1688_v19 = vpop.eup %1687  ;;  %1551 = vmatprep.mubr.msk.bf16.mxu0 %vm693_vm2, %v1659_v15 }
  0xed   :  { %v1690_v20 = vpop.eup %1689  ;;  %v1505_v21 = vpop.f32.mrb[8].mxu0  ;;  %v507_v22 = vpack.c.bf16 %v1688_v19, %v1684_v16 }
  0xee   :  { %v452_v23 = vadd.f32 %v1505_v21, %v2070_v14  ;;  %v443_v24 = vpop.f32.mrb[9].mxu0  ;;  %v506_v25 = vpack.c.bf16 %v1690_v20, %v1686_v17  ;;  %v2116_v16 = vpop.permute.xlu0 %151 }
  0xef   :  { %v444_v27 = vadd.f32 %v443_v24, %v2063_v5  ;;  %v1506_v28 = vpop.f32.mrb[10].mxu0  ;;  %v2118_v17 = vpop.permute.xlu1 %156 }
  0xf0   :  { %1699 = vtanh.f32 %v452_v23  ;;  %v455_v29 = vadd.f32 %v1506_v28, %v2073_v18  ;;  %v446_v30 = vpop.f32.mrb[11].mxu0  ;;  %1511 = vmatprep.subr.bf16.mxu1 %v506_v25 }
  0xf1   :  { %1701 = vtanh.f32 %v444_v27  ;;  %v447_v32 = vadd.f32 %v446_v30, %v2065_v6  ;;  %1512 = vmatpush3.bf16.msra.mxu1 %v506_v25 }
  0xf2   :  { %v1692_v33 = vpop.eup %1691  ;;  %1703 = vtanh.f32 %v455_v29  ;;  %1513 = vmatprep.subr.bf16.mxu1 %v507_v22  ;;  %v2120_v19 = vpop.permute.xlu0 %161 }
  0xf3   :  { %v1694_v34 = vpop.eup %1693  ;;  %1705 = vtanh.f32 %v447_v32  ;;  %v2122_v20 = vpop.permute.xlu1 %166 }
  0xf4   :  { %v1696_v35 = vpop.eup %1695 }
  0xf5   :  { %v1698_v36 = vpop.eup %1697  ;;  %v1509_v38 = vpop.f32.mrb[12].mxu0  ;;  %1514 = vmatpush3.bf16.msra.mxu1 %v507_v22  ;;  %v509_v39 = vpack.c.bf16 %v1696_v35, %v1692_v33 }
  0xf6   :  { %v468_v40 = vadd.f32 %v1509_v38, %v2083_v37  ;;  %v459_v41 = vpop.f32.mrb[13].mxu0  ;;  %v508_v42 = vpack.c.bf16 %v1698_v36, %v1694_v34  ;;  %v2124_v21 = vpop.permute.xlu0 %171 }
  0xf7   :  { %v460_v44 = vadd.f32 %v459_v41, %v2076_v26  ;;  %v1510_v45 = vpop.f32.mrb[14].mxu0  ;;  %v2126_v22 = vpop.permute.xlu1 %176 }
  0xf8   :  { %1707 = vtanh.f32 %v468_v40  ;;  %v471_v46 = vadd.f32 %v1510_v45, %v2086_v43  ;;  %v462_v47 = vpop.f32.mrb[15].mxu0  ;;  %1515 = vmatprep.subr.bf16.mxu1 %v508_v42 }
  0xf9   :  { %1709 = vtanh.f32 %v460_v44  ;;  %v463_v48 = vadd.f32 %v462_v47, %v2080_v31  ;;  %1516 = vmatpush3.bf16.msra.mxu1 %v508_v42 }
  0xfa   :  { %v1700_v49 = vpop.eup %1699  ;;  %1711 = vtanh.f32 %v471_v46  ;;  %1517 = vmatprep.subr.bf16.mxu1 %v509_v39  ;;  %v2128_v23 = vpop.permute.xlu0 %191 }
  0xfb   :  { %v1702_v50 = vpop.eup %1701  ;;  %1713 = vtanh.f32 %v463_v48  ;;  %v2130_v27 = vpop.permute.xlu1 %196 }
  0xfc   :  { %v1704_v51 = vpop.eup %1703 }
  0xfd   :  { %v1706_v52 = vpop.eup %1705  ;;  %1518 = vmatpush3.bf16.msra.mxu1 %v509_v39  ;;  %v511_v60 = vpack.c.bf16 %v1704_v51, %v1700_v49 }
  0xfe   :  { %v510_v61 = vpack.c.bf16 %v1706_v52, %v1702_v50  ;;  %v2134_v33 = vpop.permute.xlu0 %181 }
  0xff   :  { %v2138_v36 = vpop.permute.xlu1 %186 }
 0x100   :  { %1519 = vmatprep.subr.bf16.mxu1 %v510_v61 }
 0x101   :  { %1520 = vmatpush3.bf16.msra.mxu1 %v510_v61 }
 0x102   :  { %v1708_v62 = vpop.eup %1707  ;;  %1521 = vmatprep.subr.bf16.mxu1 %v511_v60  ;;  %v2140_v42 = vpop.permute.xlu0 %201 }
 0x103   :  { %v1710_v0 = vpop.eup %1709  ;;  %v2144_v46 = vpop.permute.xlu1 %206 }
 0x104   :  { %v1712_v1 = vpop.eup %1711 }
 0x105   :  { %v1714_v2 = vpop.eup %1713  ;;  %1522 = vmatpush3.bf16.msra.mxu1 %v511_v60  ;;  %v513_v3 = vpack.c.bf16 %v1712_v1, %v1708_v62 }
 0x106   :  { %v512_v4 = vpack.c.bf16 %v1714_v2, %v1710_v0  ;;  %v2149_v60 = vpop.permute.xlu0 %211 }
 0x108   :  { %1523 = vmatprep.subr.bf16.mxu1 %v512_v4 }
 0x109   :  { %1524 = vmatpush3.bf16.msra.mxu1 %v512_v4 }
 0x10a   :  { %1525 = vmatprep.subr.bf16.mxu1 %v513_v3  ;;  %v2156_v15 = vpop.permute.xlu0 %221 }
 0x10d   :  { %1526 = vmatpush3.bf16.msra.mxu1 %v513_v3 }
 0x110   :  { %1528 = vmatmul.mubr.bf16.vlgmr.msra.gmra.mrb[0].mxu1 %v1652_v7  ;;  %v2153_v7 = vpop.permute.xlu1 %216 }
 0x111   :  { %1531 = vmatprep.mubr.bf16.mxu1 %v1653_v8 }
 0x118   :  { %1532 = vmatmul.mubr.bf16.gmra.mrb[4].mxu1 %v1654_v9 }
 0x119   :  { %1535 = vmatprep.mubr.bf16.mxu1 %v1655_v10 }
 0x120   :  { %1536 = vmatmul.mubr.bf16.gmra.mrb[8].mxu1 %v1656_v11 }
 0x121   :  { %1539 = vmatprep.mubr.bf16.mxu1 %v1657_v12 }
 0x128   :  { %1540 = vmatmul.mubr.bf16.gmra.mrb[12].mxu1 %v1658_v13 }
 0x1e3   :  { %v1529_v24 = vpop.f32.mrb[0].mxu1 }
 0x1e4   :  { %v596_v25 = vpop.f32.mrb[1].mxu1  ;;  %v605_v30 = vadd.f32 %v1529_v24, %v2120_v19 }
 0x1e5   :  { %v1530_v28 = vpop.f32.mrb[2].mxu1  ;;  %v597_v32 = vadd.f32 %v596_v25, %v2116_v16 }
 0x1e6   :  { %v599_v29 = vpop.f32.mrb[3].mxu1  ;;  %v608_v34 = vadd.f32 %v1530_v28, %v2122_v20  ;;  %1715 = vtanh.f32 %v605_v30 }
 0x1e7   :  { %v600_v35 = vadd.f32 %v599_v29, %v2118_v17  ;;  %1717 = vtanh.f32 %v597_v32  ;;  %v2159_v32 = vpop.permute.xlu1 %226 }
 0x1e8   :  { %1719 = vtanh.f32 %v608_v34 }
 0x1e9   :  { %1721 = vtanh.f32 %v600_v35 }
 0x1eb   :  { %v1533_v38 = vpop.f32.mrb[4].mxu1 }
 0x1ec   :  { %v612_v39 = vpop.f32.mrb[5].mxu1  ;;  %v621_v44 = vadd.f32 %v1533_v38, %v2134_v33 }
 0x1ed   :  { %v1534_v40 = vpop.f32.mrb[6].mxu1  ;;  %v613_v45 = vadd.f32 %v612_v39, %v2124_v21 }
 0x1ee   :  { %v615_v41 = vpop.f32.mrb[7].mxu1  ;;  %v624_v47 = vadd.f32 %v1534_v40, %v2138_v36  ;;  %1723 = vtanh.f32 %v621_v44 }
 0x1ef   :  { %v616_v48 = vadd.f32 %v615_v41, %v2126_v22  ;;  %1725 = vtanh.f32 %v613_v45 }
 0x1f0   :  { %v1716_v52 = vpop.eup %1715  ;;  %1727 = vtanh.f32 %v624_v47 }
 0x1f1   :  { %v1718_v0 = vpop.eup %1717  ;;  %1729 = vtanh.f32 %v616_v48 }
 0x1f2   :  { %v1720_v4 = vpop.eup %1719 }
 0x1f3   :  { %v1537_v49 = vpop.f32.mrb[8].mxu1  ;;  %v1722_v10 = vpop.eup %1721 }
 0x1f4   :  { %v637_v50 = vadd.f32 %v1537_v49, %v2140_v42  ;;  %v628_v51 = vpop.f32.mrb[9].mxu1 }
 0x1f5   :  { %v629_v61 = vadd.f32 %v628_v51, %v2128_v23  ;;  %v1538_v62 = vpop.f32.mrb[10].mxu1 }
 0x1f6   :  { %v669_v1 = vadd.f32 %v1716_v52, %v637_v50  ;;  %v640_v2 = vadd.f32 %v1538_v62, %v2144_v46  ;;  %v631_v3 = vpop.f32.mrb[11].mxu1  ;;  %v1820_v62 = vmov 0.0  }
 0x1f7   :  { %v667_v8 = vadd.f32 %v1718_v0, %v629_v61  ;;  %v632_v9 = vadd.f32 %v631_v3, %v2130_v27  ;;  %v1660_v61 = vld [vmem:[%s2335_s5 + $0x8] sm:$0xff]  }
 0x1f8   :  { %v670_v11 = vadd.f32 %v1720_v4, %v640_v2  ;;  %v1724_v30 = vpop.eup %1723 }
 0x1f9   :  { %v668_v12 = vadd.f32 %v1722_v10, %v632_v9  ;;  %v1726_v38 = vpop.eup %1725 }
 0x1fa   :  { %v680_v13 = vpack.c.bf16 %v670_v11, %v669_v1  ;;  %v1728_v44 = vpop.eup %1727  ;;  %v2171_v1 = vpop.permute.xlu0 %235 }
 0x1fb   :  { %v1541_v24 = vpop.f32.mrb[12].mxu1  ;;  %v679_v25 = vpack.c.bf16 %v668_v12, %v667_v8  ;;  %v1730_v48 = vpop.eup %1729 }
 0x1fc   :  { %v653_v28 = vadd.f32 %v1541_v24, %v2156_v15  ;;  %v644_v29 = vpop.f32.mrb[13].mxu1  ;;  %v2174_v8 = vpop.permute.xlu1 %240 }
 0x1fd   :  { %v645_v34 = vadd.f32 %v644_v29, %v2149_v60  ;;  %v1542_v35 = vpop.f32.mrb[14].mxu1  ;;  %1543 = vmatprep.subr.bf16.mxu0 %v679_v25 }
 0x1fe   :  { %v673_v39 = vadd.f32 %v1724_v30, %v653_v28  ;;  %v656_v40 = vadd.f32 %v1542_v35, %v2159_v32  ;;  %v647_v41 = vpop.f32.mrb[15].mxu1  ;;  %1544 = vmatpush3.bf16.msra.mxu0 %v679_v25  ;;  %v2177_v11 = vpop.permute.xlu0 %245 }
 0x1ff   :  { %v671_v45 = vadd.f32 %v1726_v38, %v645_v34  ;;  %v648_v47 = vadd.f32 %v647_v41, %v2153_v7  ;;  %1545 = vmatprep.subr.bf16.mxu0 %v680_v13 }
 0x200   :  { %v674_v49 = vadd.f32 %v1728_v44, %v656_v40  ;;  %v2179_v12 = vpop.permute.xlu1 %250  ;;  %v1662_v44 = vld [vmem:[%s2330_s0 + $0x4] ss:$8 sps:$4 sm:$0xff]  }
 0x201   :  { %v672_v50 = vadd.f32 %v1730_v48, %v648_v47  ;;  %v1661_v47 = vld [vmem:[%s2338_s8] sm:$0x1f]  }
 0x202   :  { %1546 = vmatpush3.bf16.msra.mxu0 %v680_v13  ;;  %v682_v51 = vpack.c.bf16 %v674_v49, %v673_v39  ;;  %v2181_v24 = vpop.permute.xlu0 %257  ;;  %v1664_v48 = vld [vmem:[%s2331_s1] sm:$0xff]   ;;  %v1663_v49 = vld [vmem:[%s2330_s0 + $0x14] ss:$8 sps:$4 sm:$0x3f]  }
 0x203   :  { %v681_v52 = vpack.c.bf16 %v672_v50, %v671_v45  ;;  %v908_v50 = vsel %vm373_vm0, %v1663_v49, 0 }
 0x204   :  { %v2185_v30 = vpop.permute.xlu1 %262 }
 0x205   :  { %1547 = vmatprep.subr.bf16.mxu0 %v681_v52 }
 0x206   :  { %1548 = vmatpush3.bf16.msra.mxu0 %v681_v52  ;;  %v1666_v52 = vld [vmem:[%s2331_s1 + $0x10] sm:$0xff]  }
 0x207   :  { %1549 = vmatprep.subr.bf16.mxu0 %v682_v51 }
 0x20a   :  { %1550 = vmatpush3.bf16.msra.mxu0 %v682_v51  ;;  %v1665_v51 = vld [vmem:[%s2331_s1 + $0x8] sm:$0xff]  }
 0x20b   :  { %1555 = vmatprep.subr.bf16.mxu0 %v1820_v62 }
 0x20d   :  { %1552 = vmatmul.mubr.msk.bf16.vlgmr.msra.gmra.mrb[16].mxu0 %vm693_vm2, %v1660_v61  ;;  %v1667_v61 = vld [vmem:[%s2331_s1 + $0x18] sm:$0xff]  }
 0x20e   :  { %1557 = vmatprep.mubr.msk.bf16.mxu0 %vm1821_vm3, %v1820_v62 }
 0x2e0   :  { %v1553_v0 = vpop.f32.mrb[16].mxu0 }
 0x2e1   :  { %v734_v2 = vpop.f32.mrb[17].mxu0  ;;  %v743_v25 = vadd.f32 %v1553_v0, %v2177_v11  ;;  %v1668_v0 = vld [vmem:[%s2331_s1 + $0x20] sm:$0xff]  }
 0x2e2   :  { %v735_v3 = vadd.f32 %v734_v2, %v2171_v1  ;;  %v1554_v4 = vpop.f32.mrb[18].mxu0  ;;  %v1669_v2 = vld [vmem:[%s2331_s1 + $0x28] sm:$0xff]  }
 0x2e3   :  { %v737_v9 = vpop.f32.mrb[19].mxu0  ;;  %v746_v35 = vadd.f32 %v1554_v4, %v2179_v12  ;;  %v1671_v4 = vld [vmem:[%s2331_s1 + $0x38] sm:$0xff]  }
 0x2e4   :  { %1731 = vtanh.f32 %v735_v3  ;;  %v738_v10 = vadd.f32 %v737_v9, %v2174_v8  ;;  %v1670_v3 = vld [vmem:[%s2331_s1 + $0x30] sm:$0xff]   ;;  %v1672_v9 = vld [vmem:[%s2333_s3] sm:$0xff]  }
 0x2e5   :  { %1597 = vmatprep.mubr.bf16.mxu1 %v1672_v9 }
 0x2e6   :  { %1733 = vtanh.f32 %v738_v10  ;;  %v2236_v10 = vpop.permute.xlu0 %269 }
 0x2ee   :  { %v1732_v13 = vpop.eup %1731 }
 0x2ef   :  { %v751_v28 = vmul.f32 %v1732_v13, %v2181_v24 }
 0x2f0   :  { %v1734_v29 = vpop.eup %1733 }
 0x2f1   :  { %v753_v34 = vadd.f32 %v751_v28, %v743_v25  ;;  %v752_v38 = vmul.f32 %v1734_v29, %v2185_v30  ;;  %v2239_v29 = vpop.permute.xlu1 %274 }
 0x2f3   :  { %v754_v39 = vadd.f32 %v752_v38, %v746_v35  ;;  %1735 = vtanh.f32 %v753_v34 }
 0x2f5   :  { %1737 = vtanh.f32 %v754_v39 }
 0x2fd   :  { %v1736_v40 = vpop.eup %1735 }
 0x2ff   :  { %v1738_v41 = vpop.eup %1737 }
 0x300   :  { %v759_v45 = vpack.c.bf16 %v1738_v41, %v1736_v40 }
 0x302   :  { %1556 = vmatpush3.bf16.msra.mxu0 %v759_v45 }
 0x303   :  { %1561 = vmatprep.subr.bf16.mxu0 %v1662_v44 }
 0x305   :  { %1558 = vmatmul.mubr.msk.bf16.vlgmr.msra.gmra.mrb[20].mxu0 %vm765_vm4, %v1661_v47 }
 0x306   :  { %1562 = vmatpush3.bf16.msra.mxu0 %v1662_v44  ;;  %1565 = vmatprep.mubr.msk.bf16.mxu0 %vm348_vm1, %v1664_v48 }
 0x307   :  { %1632 = vmatprep.subr.msk.bf16.mxu0 %vm373_vm0, %v1663_v49 }
 0x30a   :  { %1564 = vmatpush3.bf16.msra.mxu0 %v908_v50 }
 0x30d   :  { %1566 = vmatmul.mubr.msk.bf16.vlgmr.msra.gmra.mrb[24].mxu0 %vm348_vm1, %v1665_v51 }
 0x30e   :  { %1569 = vmatprep.mubr.msk.bf16.mxu0 %vm348_vm1, %v1666_v52 }
 0x315   :  { %1570 = vmatmul.mubr.msk.bf16.gmra.mrb[28].mxu0 %vm348_vm1, %v1667_v61 }
 0x316   :  { %1573 = vmatprep.mubr.msk.bf16.mxu0 %vm348_vm1, %v1668_v0 }
 0x31d   :  { %1574 = vmatmul.mubr.msk.bf16.gmra.mrb[32].mxu0 %vm348_vm1, %v1669_v2 }
 0x31e   :  { %1577 = vmatprep.mubr.msk.bf16.mxu0 %vm348_vm1, %v1670_v3 }
 0x325   :  { %1578 = vmatmul.mubr.msk.bf16.gmra.mrb[36].mxu0 %vm348_vm1, %v1671_v4 }
 0x3d8   :  { %v803_v13 = vpop.f32.mrb[20].mxu0 }
 0x3d9   :  { %v804_v25 = vadd.f32 %v803_v13, %v2236_v10  ;;  %v1559_v28 = vpop.f32.mrb[21].mxu0 }
 0x3da   :  { %v806_v34 = vpop.f32.mrb[22].mxu0 }
 0x3db   :  { %810 = vst [vmem:[#allocation2] sm:$0xff] %v804_v25  ;;  %v807_v35 = vadd.f32 %v806_v34, %v2239_v29  ;;  %v1560_v38 = vpop.f32.mrb[23].mxu0 }
 0x3dd   :  { %811 = vst [vmem:[#allocation2 + $0x10] sm:$0x1] %v807_v35 }
 0x3e0   :  { %v1567_v39 = vpop.f32.mrb[24].mxu0 }
 0x3e1   :  { %v953_v40 = vadd.f32 %v1567_v39, %v2045_v54  ;;  %v944_v41 = vpop.f32.mrb[25].mxu0 }
 0x3e2   :  { %v945_v44 = vadd.f32 %v944_v41, %v2043_v53  ;;  %v1568_v45 = vpop.f32.mrb[26].mxu0 }
 0x3e3   :  { %1739 = vtanh.f32 %v953_v40  ;;  %v956_v47 = vadd.f32 %v1568_v45, %v2049_v56  ;;  %v947_v48 = vpop.f32.mrb[27].mxu0 }
 0x3e4   :  { %1741 = vtanh.f32 %v945_v44  ;;  %v948_v49 = vadd.f32 %v947_v48, %v2047_v55 }
 0x3e5   :  { %1743 = vtanh.f32 %v956_v47 }
 0x3e6   :  { %1745 = vtanh.f32 %v948_v49 }
 0x3e8   :  { %v1571_v50 = vpop.f32.mrb[28].mxu0 }
 0x3e9   :  { %v969_v51 = vadd.f32 %v1571_v50, %v2055_v59  ;;  %v960_v52 = vpop.f32.mrb[29].mxu0 }
 0x3ea   :  { %v961_v61 = vadd.f32 %v960_v52, %v2051_v57  ;;  %v1572_v54 = vpop.f32.mrb[30].mxu0 }
 0x3eb   :  { %1747 = vtanh.f32 %v969_v51  ;;  %v972_v53 = vadd.f32 %v1572_v54, %v2058_v63  ;;  %v963_v0 = vpop.f32.mrb[31].mxu0 }
 0x3ec   :  { %1749 = vtanh.f32 %v961_v61  ;;  %v964_v56 = vadd.f32 %v963_v0, %v2053_v58 }
 0x3ed   :  { %v1740_v2 = vpop.eup %1739  ;;  %1751 = vtanh.f32 %v972_v53 }
 0x3ee   :  { %v1742_v3 = vpop.eup %1741  ;;  %1753 = vtanh.f32 %v964_v56 }
 0x3ef   :  { %v1744_v55 = vpop.eup %1743 }
 0x3f0   :  { %v1746_v4 = vpop.eup %1745  ;;  %v1575_v9 = vpop.f32.mrb[32].mxu0  ;;  %v1040_v13 = vpack.c.bf16 %v1744_v55, %v1740_v2  ;;  %v1674_v55 = vld [vmem:[%s2333_s3 + $0x10] sm:$0xff]  }
 0x3f1   :  { %v985_v59 = vadd.f32 %v1575_v9, %v2070_v14  ;;  %v976_v25 = vpop.f32.mrb[33].mxu0  ;;  %v1039_v57 = vpack.c.bf16 %v1746_v4, %v1742_v3  ;;  %v1673_v3 = vld [vmem:[%s2333_s3 + $0x8] sm:$0xff]   ;;  %v1675_v4 = vld [vmem:[%s2333_s3 + $0x18] sm:$0xff]   ;;  %v1676_v9 = vld [vmem:[%s2333_s3 + $0x20] sm:$0xff]  }
 0x3f2   :  { %v977_v28 = vadd.f32 %v976_v25, %v2063_v5  ;;  %v1576_v34 = vpop.f32.mrb[34].mxu0  ;;  %v1679_v25 = vld [vmem:[%s2333_s3 + $0x38] sm:$0xff]  }
 0x3f3   :  { %1755 = vtanh.f32 %v985_v59  ;;  %v988_v63 = vadd.f32 %v1576_v34, %v2073_v18  ;;  %v979_v35 = vpop.f32.mrb[35].mxu0  ;;  %1581 = vmatprep.subr.bf16.mxu1 %v1039_v57  ;;  %v1678_v59 = vld [vmem:[%s2333_s3 + $0x30] sm:$0xff]  }
 0x3f4   :  { %1757 = vtanh.f32 %v977_v28  ;;  %v980_v58 = vadd.f32 %v979_v35, %v2065_v6  ;;  %1582 = vmatpush3.bf16.msra.mxu1 %v1039_v57  ;;  %v1680_v57 = vld [vmem:[%s2335_s5] sm:$0xff]  }
 0x3f5   :  { %v1748_v38 = vpop.eup %1747  ;;  %1759 = vtanh.f32 %v988_v63  ;;  %1583 = vmatprep.subr.bf16.mxu1 %v1040_v13  ;;  %1621 = vmatprep.mubr.msk.bf16.mxu0 %vm693_vm2, %v1680_v57 }
 0x3f6   :  { %v1750_v39 = vpop.eup %1749  ;;  %1761 = vtanh.f32 %v980_v58 }
 0x3f7   :  { %v1752_v14 = vpop.eup %1751 }
 0x3f8   :  { %v1754_v40 = vpop.eup %1753  ;;  %v1579_v41 = vpop.f32.mrb[36].mxu0  ;;  %1584 = vmatpush3.bf16.msra.mxu1 %v1040_v13  ;;  %v1042_v5 = vpack.c.bf16 %v1752_v14, %v1748_v38  ;;  %v1677_v13 = vld [vmem:[%s2333_s3 + $0x28] sm:$0xff]  }
 0x3f9   :  { %v1001_v44 = vadd.f32 %v1579_v41, %v2083_v37  ;;  %v992_v45 = vpop.f32.mrb[37].mxu0  ;;  %v1041_v18 = vpack.c.bf16 %v1754_v40, %v1750_v39 }
 0x3fa   :  { %v993_v47 = vadd.f32 %v992_v45, %v2076_v26  ;;  %v1580_v48 = vpop.f32.mrb[38].mxu0 }
 0x3fb   :  { %1763 = vtanh.f32 %v1001_v44  ;;  %v1004_v6 = vadd.f32 %v1580_v48, %v2086_v43  ;;  %v995_v49 = vpop.f32.mrb[39].mxu0  ;;  %1585 = vmatprep.subr.bf16.mxu1 %v1041_v18 }
 0x3fc   :  { %1765 = vtanh.f32 %v993_v47  ;;  %v996_v50 = vadd.f32 %v995_v49, %v2080_v31  ;;  %1586 = vmatpush3.bf16.msra.mxu1 %v1041_v18 }
 0x3fd   :  { %v1756_v51 = vpop.eup %1755  ;;  %1767 = vtanh.f32 %v1004_v6  ;;  %1587 = vmatprep.subr.bf16.mxu1 %v1042_v5 }
 0x3fe   :  { %v1758_v52 = vpop.eup %1757  ;;  %1769 = vtanh.f32 %v996_v50 }
 0x3ff   :  { %v1760_v37 = vpop.eup %1759 }
 0x400   :  { %v1762_v61 = vpop.eup %1761  ;;  %1588 = vmatpush3.bf16.msra.mxu1 %v1042_v5  ;;  %v1044_v54 = vpack.c.bf16 %v1760_v37, %v1756_v51 }
 0x401   :  { %v1043_v26 = vpack.c.bf16 %v1762_v61, %v1758_v52 }
 0x403   :  { %1589 = vmatprep.subr.bf16.mxu1 %v1043_v26 }
 0x404   :  { %1590 = vmatpush3.bf16.msra.mxu1 %v1043_v26 }
 0x405   :  { %v1764_v53 = vpop.eup %1763  ;;  %1591 = vmatprep.subr.bf16.mxu1 %v1044_v54 }
 0x406   :  { %v1766_v43 = vpop.eup %1765 }
 0x407   :  { %v1768_v0 = vpop.eup %1767 }
 0x408   :  { %v1770_v56 = vpop.eup %1769  ;;  %1592 = vmatpush3.bf16.msra.mxu1 %v1044_v54  ;;  %v1046_v31 = vpack.c.bf16 %v1768_v0, %v1764_v53 }
 0x409   :  { %v1045_v2 = vpack.c.bf16 %v1770_v56, %v1766_v43 }
 0x40b   :  { %1593 = vmatprep.subr.bf16.mxu1 %v1045_v2 }
 0x40c   :  { %1594 = vmatpush3.bf16.msra.mxu1 %v1045_v2 }
 0x40d   :  { %1595 = vmatprep.subr.bf16.mxu1 %v1046_v31 }
 0x410   :  { %1596 = vmatpush3.bf16.msra.mxu1 %v1046_v31 }
 0x413   :  { %1598 = vmatmul.mubr.bf16.vlgmr.msra.gmra.mrb[16].mxu1 %v1673_v3 }
 0x414   :  { %1601 = vmatprep.mubr.bf16.mxu1 %v1674_v55 }
 0x41b   :  { %1602 = vmatmul.mubr.bf16.gmra.mrb[20].mxu1 %v1675_v4 }
 0x41c   :  { %1605 = vmatprep.mubr.bf16.mxu1 %v1676_v9 }
 0x423   :  { %1606 = vmatmul.mubr.bf16.gmra.mrb[24].mxu1 %v1677_v13 }
 0x424   :  { %1609 = vmatprep.mubr.bf16.mxu1 %v1678_v59 }
 0x42b   :  { %1610 = vmatmul.mubr.bf16.gmra.mrb[28].mxu1 %v1679_v25 }
 0x4e6   :  { %v1599_v28 = vpop.f32.mrb[16].mxu1 }
 0x4e7   :  { %v1129_v34 = vpop.f32.mrb[17].mxu1  ;;  %v1138_v58 = vadd.f32 %v1599_v28, %v2120_v19 }
 0x4e8   :  { %v1600_v63 = vpop.f32.mrb[18].mxu1  ;;  %v1130_v38 = vadd.f32 %v1129_v34, %v2116_v16 }
 0x4e9   :  { %v1132_v35 = vpop.f32.mrb[19].mxu1  ;;  %v1141_v39 = vadd.f32 %v1600_v63, %v2122_v20  ;;  %1771 = vtanh.f32 %v1138_v58 }
 0x4ea   :  { %v1133_v14 = vadd.f32 %v1132_v35, %v2118_v17  ;;  %1773 = vtanh.f32 %v1130_v38 }
 0x4eb   :  { %1775 = vtanh.f32 %v1141_v39 }
 0x4ec   :  { %1777 = vtanh.f32 %v1133_v14 }
 0x4ee   :  { %v1603_v40 = vpop.f32.mrb[20].mxu1 }
 0x4ef   :  { %v1145_v41 = vpop.f32.mrb[21].mxu1  ;;  %v1154_v45 = vadd.f32 %v1603_v40, %v2134_v33 }
 0x4f0   :  { %v1604_v5 = vpop.f32.mrb[22].mxu1  ;;  %v1146_v18 = vadd.f32 %v1145_v41, %v2124_v21 }
 0x4f1   :  { %v1148_v44 = vpop.f32.mrb[23].mxu1  ;;  %v1157_v19 = vadd.f32 %v1604_v5, %v2138_v36  ;;  %1779 = vtanh.f32 %v1154_v45 }
 0x4f2   :  { %v1149_v16 = vadd.f32 %v1148_v44, %v2126_v22  ;;  %1781 = vtanh.f32 %v1146_v18 }
 0x4f3   :  { %v1772_v48 = vpop.eup %1771  ;;  %1783 = vtanh.f32 %v1157_v19 }
 0x4f4   :  { %v1774_v50 = vpop.eup %1773  ;;  %1785 = vtanh.f32 %v1149_v16 }
 0x4f5   :  { %v1776_v36 = vpop.eup %1775 }
 0x4f6   :  { %v1607_v20 = vpop.f32.mrb[24].mxu1  ;;  %v1778_v37 = vpop.eup %1777 }
 0x4f7   :  { %v1170_v17 = vadd.f32 %v1607_v20, %v2140_v42  ;;  %v1161_v47 = vpop.f32.mrb[25].mxu1 }
 0x4f8   :  { %v1162_v6 = vadd.f32 %v1161_v47, %v2128_v23  ;;  %v1608_v49 = vpop.f32.mrb[26].mxu1 }
 0x4f9   :  { %v1202_v33 = vadd.f32 %v1772_v48, %v1170_v17  ;;  %v1173_v21 = vadd.f32 %v1608_v49, %v2144_v46  ;;  %v1164_v51 = vpop.f32.mrb[27].mxu1 }
 0x4fa   :  { %v1200_v52 = vadd.f32 %v1774_v50, %v1162_v6  ;;  %v1165_v22 = vadd.f32 %v1164_v51, %v2130_v27 }
 0x4fb   :  { %v1203_v61 = vadd.f32 %v1776_v36, %v1173_v21  ;;  %v1780_v0 = vpop.eup %1779 }
 0x4fc   :  { %v1201_v54 = vadd.f32 %v1778_v37, %v1165_v22  ;;  %v1782_v46 = vpop.eup %1781 }
 0x4fd   :  { %v1213_v42 = vpack.c.bf16 %v1203_v61, %v1202_v33  ;;  %v1784_v27 = vpop.eup %1783 }
 0x4fe   :  { %v1611_v26 = vpop.f32.mrb[28].mxu1  ;;  %v1212_v53 = vpack.c.bf16 %v1201_v54, %v1200_v52  ;;  %v1786_v13 = vpop.eup %1785 }
 0x4ff   :  { %v1186_v43 = vadd.f32 %v1611_v26, %v2156_v15  ;;  %v1177_v23 = vpop.f32.mrb[29].mxu1 }
 0x500   :  { %v1178_v56 = vadd.f32 %v1177_v23, %v2149_v60  ;;  %v1612_v31 = vpop.f32.mrb[30].mxu1  ;;  %1613 = vmatprep.subr.bf16.mxu0 %v1212_v53  ;;  %v1681_v60 = vld [vmem:[%s2335_s5 + $0x8] sm:$0xff]  }
 0x501   :  { %v1206_v2 = vadd.f32 %v1780_v0, %v1186_v43  ;;  %v1189_v3 = vadd.f32 %v1612_v31, %v2159_v32  ;;  %v1180_v55 = vpop.f32.mrb[31].mxu1  ;;  %1614 = vmatpush3.bf16.msra.mxu0 %v1212_v53 }
 0x502   :  { %v1204_v4 = vadd.f32 %v1782_v46, %v1178_v56  ;;  %v1181_v9 = vadd.f32 %v1180_v55, %v2153_v7  ;;  %1615 = vmatprep.subr.bf16.mxu0 %v1213_v42 }
 0x503   :  { %v1207_v59 = vadd.f32 %v1784_v27, %v1189_v3 }
 0x504   :  { %v1205_v15 = vadd.f32 %v1786_v13, %v1181_v9 }
 0x505   :  { %1616 = vmatpush3.bf16.msra.mxu0 %v1213_v42  ;;  %v1215_v25 = vpack.c.bf16 %v1207_v59, %v1206_v2 }
 0x506   :  { %v1214_v57 = vpack.c.bf16 %v1205_v15, %v1204_v4 }
 0x508   :  { %1617 = vmatprep.subr.bf16.mxu0 %v1214_v57 }
 0x509   :  { %1618 = vmatpush3.bf16.msra.mxu0 %v1214_v57 }
 0x50a   :  { %1619 = vmatprep.subr.bf16.mxu0 %v1215_v25 }
 0x50d   :  { %1620 = vmatpush3.bf16.msra.mxu0 %v1215_v25 }
 0x50e   :  { %1625 = vmatprep.subr.bf16.mxu0 %v1820_v62 }
 0x510   :  { %1622 = vmatmul.mubr.msk.bf16.vlgmr.msra.gmra.mrb[40].mxu0 %vm693_vm2, %v1681_v60 }
 0x511   :  { %1627 = vmatprep.mubr.msk.bf16.mxu0 %vm1821_vm3, %v1820_v62 }
 0x5e3   :  { %v1623_v7 = vpop.f32.mrb[40].mxu0 }
 0x5e4   :  { %v1266_v32 = vpop.f32.mrb[41].mxu0  ;;  %v1275_v38 = vadd.f32 %v1623_v7, %v2177_v11 }
 0x5e5   :  { %v1267_v28 = vadd.f32 %v1266_v32, %v2171_v1  ;;  %v1624_v34 = vpop.f32.mrb[42].mxu0 }
 0x5e6   :  { %v1269_v63 = vpop.f32.mrb[43].mxu0  ;;  %v1278_v41 = vadd.f32 %v1624_v34, %v2179_v12 }
 0x5e7   :  { %1787 = vtanh.f32 %v1267_v28  ;;  %v1270_v35 = vadd.f32 %v1269_v63, %v2174_v8  ;;  %v1682_v8 = vld [vmem:[%s2338_s8] sm:$0x1f]  }
 0x5e9   :  { %1789 = vtanh.f32 %v1270_v35 }
 0x5f1   :  { %v1788_v58 = vpop.eup %1787 }
 0x5f2   :  { %v1283_v39 = vmul.f32 %v1788_v58, %v2181_v24 }
 0x5f3   :  { %v1790_v14 = vpop.eup %1789 }
 0x5f4   :  { %v1285_v40 = vadd.f32 %v1283_v39, %v1275_v38  ;;  %v1284_v62 = vmul.f32 %v1790_v14, %v2185_v30 }
 0x5f6   :  { %v1286_v5 = vadd.f32 %v1284_v62, %v1278_v41  ;;  %1791 = vtanh.f32 %v1285_v40 }
 0x5f8   :  { %1793 = vtanh.f32 %v1286_v5 }
 0x600   :  { %v1792_v1 = vpop.eup %1791 }
 0x602   :  { %v1794_v44 = vpop.eup %1793 }
 0x603   :  { %v1291_v45 = vpack.c.bf16 %v1794_v44, %v1792_v1 }
 0x605   :  { %1626 = vmatpush3.bf16.msra.mxu0 %v1291_v45 }
 0x608   :  { %1628 = vmatmul.mubr.msk.bf16.vlgmr.msra.gmra.mrb[44].mxu0 %vm765_vm4, %v1682_v8 }
 0x6db   :  { %v1334_v11 = vpop.f32.mrb[44].mxu0 }
 0x6dc   :  { %v1335_v12 = vadd.f32 %v1334_v11, %v2236_v10  ;;  %v1629_v24 = vpop.f32.mrb[45].mxu0 }
 0x6dd   :  { %v1337_v30 = vpop.f32.mrb[46].mxu0 }
 0x6de   :  { %1341 = vst [vmem:[#allocation2 + $0x8] sm:$0xff] %v1335_v12  ;;  %v1338_v18 = vadd.f32 %v1337_v30, %v2239_v29  ;;  %v1630_v19 = vpop.f32.mrb[47].mxu0 }
 0x6e0   :  { %1342 = vst [vmem:[#allocation2 + $0x18] sm:$0x1] %v1338_v18 }
 0x6e1   :  { %1806 = shalt.err (!%p1803_p4)
}
 0x6e2   :  { %s1807_s19 = scalar_lea.hbm %s2340_s10, 512 }
 0x6e3   :  { %p1808_p5 = scmp.ne.s32.totalorder %s2340_s10, %s1807_s19  ;;  %p1811_p6 = scmp.lt.u32.totalorder %s1807_s19, %s2340_s10 }
 0x6e5   :  { %p1813_p7 = pnand %p1811_p6, %p1808_p5 }
 0x6e7   :  { %1816 = shalt.err (!%p1813_p7)
}
 0x6e8   :  { %s1823_s1 = smov 256   ;;  %s1824_s23 = smov 16  }
 0x6e9   :  { %1354 = dma.vmem_to_hbm [thread:$0]  %s1349_s16, 512, %s2340_s10, [#allocation3], %s1823_s1, %s1823_s1, %s1824_s23  }
 0x6ea   :  { %1817 = dma.done.wait [#allocation3], 512  }
 0x6eb   :  { %1818 = vsyncadd [#allocation3], 4294966784 }
 0x6ec   :  { %1358 = vsyncpa [#allocation3], 1 }

</bundles_post_ra>
